<compile_context>
chip_gen: v6e
topology: v6e:2x2x1
jax: 0.10.0
libtpu: 0.0.40
codegen_flags: <defaults>
</compile_context>

<pallas_src>
import jax
import jax.numpy as jnp
from jax.experimental import pallas as pl
from jax.experimental.pallas import tpu as pltpu


def _mlp_kernel(x_ref, w1_ref, b1_ref, w2_ref, b2_ref, o_ref):
    """One batch tile of the MLP, batch on the lane (last) dimension.

    x_ref  : (4, TB)  features x batch-tile
    w1_ref : (16, 4)  line1 weight (torch layout: out x in)
    b1_ref : (16, 1)  line1 bias
    w2_ref : (16, 1)  line2 weight, stored as (in, out=1)
    b2_ref : (1, 1)   line2 bias
    o_ref  : (1, TB)  output tile
    """
    x = x_ref[...]                            # (4, TB)
    w1 = w1_ref[...]                          # (16, 4)

    # hidden = relu(W1 @ x + b1): K=4, so do 4 broadcast FMAs on the VPU
    # instead of an MXU matmul (which would use <4% of a tile and pay the
    # push/pop latency for nothing).
    h = w1[:, 0:1] * x[0:1, :]                # (16, TB)
    for k in range(1, 4):
        h = h + w1[:, k:k + 1] * x[k:k + 1, :]
    h = jnp.maximum(h + b1_ref[...], 0.0)     # (16, TB)

    # out = w2 . h + b2 : multiply along sublanes, 16 -> 1 reduction (XLU),
    # then a full-lane (unmasked) store of the (1, TB) slab.
    o_ref[...] = jnp.sum(w2_ref[...] * h, axis=0, keepdims=True) + b2_ref[...]


def _round_up(x, m):
    return ((x + m - 1) // m) * m


def mlp_forward(x, w1, b1, w2, b2, *, block_b=2048):
    """x: (B, 4) f32 -> (B, 1) f32 using a lane-dense, batch-tiled Pallas kernel.

    block_b: batch-tile width in lanes (multiple of 128).  (4, 2048) f32 input
    tiles are 32 KiB each, comfortably under the scoped-VMEM default on
    v5e/v6e/v7x even double-buffered.
    """
    B = x.shape[0]
    tb = min(block_b, _round_up(max(B, 1), 128))
    bp = _round_up(B, tb)

    xt = x.T                                  # (4, B): batch -> lanes
    if bp != B:
        xt = jnp.pad(xt, ((0, 0), (0, bp - B)))

    grid = (bp // tb,)
    out_t = pl.pallas_call(
        _mlp_kernel,
        out_shape=jax.ShapeDtypeStruct((1, bp), jnp.float32),
        grid_spec=pltpu.PrefetchScalarGridSpec(
            num_scalar_prefetch=0,
            grid=grid,
            in_specs=[
                pl.BlockSpec((4, tb), lambda i: (0, i)),    # x batch tile
                pl.BlockSpec((16, 4), lambda i: (0, 0)),    # w1 (full)
                pl.BlockSpec((16, 1), lambda i: (0, 0)),    # b1 (full)
                pl.BlockSpec((16, 1), lambda i: (0, 0)),    # w2 (full)
                pl.BlockSpec((1, 1), lambda i: (0, 0)),     # b2 (full)
            ],
            out_specs=pl.BlockSpec((1, tb), lambda i: (0, i)),
        ),
        compiler_params=pltpu.CompilerParams(
            # Independent batch tiles -> shard grid steps across TCs (v7x megacore).
            dimension_semantics=("parallel",)),
    )(xt, w1, b1, w2, b2)

    return out_t[:, :B].T                     # (B, 1)


def init_params(key):
    """Deterministic init mimicking torch.nn.Linear (U(-1/sqrt(fan_in), +))."""
    k1, k2, k3, k4 = jax.random.split(key, 4)
    bound1 = 1.0 / jnp.sqrt(4.0)
    bound2 = 1.0 / jnp.sqrt(16.0)
    # line1.weight in torch layout (out, in) = (16, 4); line1.bias as (16, 1)
    w1 = jax.random.uniform(k1, (16, 4), jnp.float32, -bound1, bound1)
    b1 = jax.random.uniform(k2, (16, 1), jnp.float32, -bound1, bound1)
    # line2.weight stored pre-transposed as (in, out) = (16, 1); bias as (1, 1)
    w2 = jax.random.uniform(k3, (16, 1), jnp.float32, -bound2, bound2)
    b2 = jax.random.uniform(k4, (1, 1), jnp.float32, -bound2, bound2)
    return w1, b1, w2, b2


if __name__ == "__main__":
    key = jax.random.PRNGKey(0)
    kx, kp, kx2 = jax.random.split(key, 3)
    w1, b1, w2, b2 = init_params(kp)

    def ref_fn(x):
        # Same math as the PyTorch module (plain JAX reference).
        return jnp.maximum(x @ w1.T + b1.T, 0.0) @ w2 + b2

    # Small demo shape implied by the module: batch=8, features=4.
    x = jax.random.normal(kx, (8, 4), jnp.float32)
    out = jax.block_until_ready(mlp_forward(x, w1, b1, w2, b2))
    assert out.shape == (8, 1)
    assert jnp.allclose(out, ref_fn(x), atol=1e-5, rtol=1e-5)

    # Non-multiple batch to exercise multi-step tiling + edge padding.
    B2 = 2048 + 173
    x2 = jax.random.normal(kx2, (B2, 4), jnp.float32)
    out2 = jax.block_until_ready(mlp_forward(x2, w1, b1, w2, b2, block_b=1024))
    assert out2.shape == (B2, 1)
    assert jnp.allclose(out2, ref_fn(x2), atol=1e-5, rtol=1e-5)

    print("KERNEL_OK")
</pallas_src>

<mosaic_0001>
module attributes {stable_mosaic.version = 11 : i64} {
  func.func @_mlp_kernel(%arg0: i32, %arg1: memref<4x128xf32, #tpu.memory_space<vmem>>, %arg2: memref<16x4xf32, #tpu.memory_space<vmem>>, %arg3: memref<16x1xf32, #tpu.memory_space<vmem>>, %arg4: memref<16x1xf32, #tpu.memory_space<vmem>>, %arg5: memref<1x1xf32, #tpu.memory_space<vmem>>, %arg6: memref<1x128xf32, #tpu.memory_space<vmem>>) attributes {dimension_semantics = [#tpu.dimension_semantics<parallel>], iteration_bounds = array<i64: 1>, scalar_prefetch = 0 : i64, scratch_operands = 0 : i64, tpu.core_type = #tpu.core_type<tc>, window_params = [{transform_indices = @transform_0, window_bounds = array<i64: 4, 128>}, {pipeline_mode = #tpu.pipeline_mode<synchronous>, transform_indices = @transform_1, window_bounds = array<i64: 16, 4>}, {pipeline_mode = #tpu.pipeline_mode<synchronous>, transform_indices = @transform_2, window_bounds = array<i64: 16, 1>}, {pipeline_mode = #tpu.pipeline_mode<synchronous>, transform_indices = @transform_3, window_bounds = array<i64: 16, 1>}, {pipeline_mode = #tpu.pipeline_mode<synchronous>, transform_indices = @transform_4, window_bounds = array<i64: 1, 1>}, {transform_indices = @transform_5, window_bounds = array<i64: 1, 128>}]} {
    %c0 = arith.constant 0 : index
    %c0_0 = arith.constant 0 : index
    %0 = vector.load %arg1[%c0, %c0_0] : memref<4x128xf32, #tpu.memory_space<vmem>>, vector<4x128xf32>
    %c0_1 = arith.constant 0 : index
    %c0_2 = arith.constant 0 : index
    %1 = vector.load %arg2[%c0_1, %c0_2] : memref<16x4xf32, #tpu.memory_space<vmem>>, vector<16x4xf32>
    %2 = vector.extract_strided_slice %1 {offsets = [0, 0], sizes = [16, 1], strides = [1, 1]} : vector<16x4xf32> to vector<16x1xf32>
    %3 = vector.extract_strided_slice %0 {offsets = [0, 0], sizes = [1, 128], strides = [1, 1]} : vector<4x128xf32> to vector<1x128xf32>
    %4 = vector.broadcast %2 : vector<16x1xf32> to vector<16x128xf32>
    %5 = vector.broadcast %3 : vector<1x128xf32> to vector<16x128xf32>
    %6 = arith.mulf %4, %5 : vector<16x128xf32>
    %7 = vector.extract_strided_slice %1 {offsets = [0, 1], sizes = [16, 1], strides = [1, 1]} : vector<16x4xf32> to vector<16x1xf32>
    %8 = vector.extract_strided_slice %0 {offsets = [1, 0], sizes = [1, 128], strides = [1, 1]} : vector<4x128xf32> to vector<1x128xf32>
    %9 = vector.broadcast %7 : vector<16x1xf32> to vector<16x128xf32>
    %10 = vector.broadcast %8 : vector<1x128xf32> to vector<16x128xf32>
    %11 = arith.mulf %9, %10 : vector<16x128xf32>
    %12 = arith.addf %6, %11 : vector<16x128xf32>
    %13 = vector.extract_strided_slice %1 {offsets = [0, 2], sizes = [16, 1], strides = [1, 1]} : vector<16x4xf32> to vector<16x1xf32>
    %14 = vector.extract_strided_slice %0 {offsets = [2, 0], sizes = [1, 128], strides = [1, 1]} : vector<4x128xf32> to vector<1x128xf32>
    %15 = vector.broadcast %13 : vector<16x1xf32> to vector<16x128xf32>
    %16 = vector.broadcast %14 : vector<1x128xf32> to vector<16x128xf32>
    %17 = arith.mulf %15, %16 : vector<16x128xf32>
    %18 = arith.addf %12, %17 : vector<16x128xf32>
    %19 = vector.extract_strided_slice %1 {offsets = [0, 3], sizes = [16, 1], strides = [1, 1]} : vector<16x4xf32> to vector<16x1xf32>
    %20 = vector.extract_strided_slice %0 {offsets = [3, 0], sizes = [1, 128], strides = [1, 1]} : vector<4x128xf32> to vector<1x128xf32>
    %21 = vector.broadcast %19 : vector<16x1xf32> to vector<16x128xf32>
    %22 = vector.broadcast %20 : vector<1x128xf32> to vector<16x128xf32>
    %23 = arith.mulf %21, %22 : vector<16x128xf32>
    %24 = arith.addf %18, %23 : vector<16x128xf32>
    %c0_3 = arith.constant 0 : index
    %c0_4 = arith.constant 0 : index
    %25 = vector.load %arg3[%c0_3, %c0_4] : memref<16x1xf32, #tpu.memory_space<vmem>>, vector<16x1xf32>
    %26 = vector.broadcast %25 : vector<16x1xf32> to vector<16x128xf32>
    %27 = arith.addf %24, %26 : vector<16x128xf32>
    %cst = arith.constant 0.000000e+00 : f32
    %28 = vector.broadcast %cst : f32 to vector<16x128xf32>
    %29 = arith.maximumf %27, %28 : vector<16x128xf32>
    %c0_5 = arith.constant 0 : index
    %c0_6 = arith.constant 0 : index
    %30 = vector.load %arg4[%c0_5, %c0_6] : memref<16x1xf32, #tpu.memory_space<vmem>>, vector<16x1xf32>
    %31 = vector.broadcast %30 : vector<16x1xf32> to vector<16x128xf32>
    %32 = arith.mulf %31, %29 : vector<16x128xf32>
    %cst_7 = arith.constant dense<0.000000e+00> : vector<128xf32>
    %33 = vector.multi_reduction <add>, %32, %cst_7 [0] : vector<16x128xf32> to vector<128xf32>
    %34 = vector.shape_cast %33 : vector<128xf32> to vector<1x128xf32>
    %c0_8 = arith.constant 0 : index
    %c0_9 = arith.constant 0 : index
    %35 = vector.load %arg5[%c0_8, %c0_9] : memref<1x1xf32, #tpu.memory_space<vmem>>, vector<1x1xf32>
    %36 = vector.broadcast %35 : vector<1x1xf32> to vector<1x128xf32>
    %37 = arith.addf %34, %36 : vector<1x128xf32>
    %c0_10 = arith.constant 0 : index
    %c0_11 = arith.constant 0 : index
    %38 = vector.load %arg6[%c0_10, %c0_11] : memref<1x128xf32, #tpu.memory_space<vmem>>, vector<1x128xf32>
    tpu.vector_store %arg6[%c0_10, %c0_11], %37 {strides = array<i32>} : memref<1x128xf32, #tpu.memory_space<vmem>>, vector<1x128xf32>,
    return
  }
  func.func @transform_0(%arg0: i32) -> (i32, i32) {
    %c0_i32 = arith.constant 0 : i32
    %c0_i32_0 = arith.constant 0 : i32
    return %c0_i32, %arg0 : i32, i32
  }
  func.func @transform_1(%arg0: i32) -> (i32, i32) {
    %c0_i32 = arith.constant 0 : i32
    %c0_i32_0 = arith.constant 0 : i32
    %c0_i32_1 = arith.constant 0 : i32
    return %c0_i32, %c0_i32_0 : i32, i32
  }
  func.func @transform_2(%arg0: i32) -> (i32, i32) {
    %c0_i32 = arith.constant 0 : i32
    %c0_i32_0 = arith.constant 0 : i32
    %c0_i32_1 = arith.constant 0 : i32
    return %c0_i32, %c0_i32_0 : i32, i32
  }
  func.func @transform_3(%arg0: i32) -> (i32, i32) {
    %c0_i32 = arith.constant 0 : i32
    %c0_i32_0 = arith.constant 0 : i32
    %c0_i32_1 = arith.constant 0 : i32
    return %c0_i32, %c0_i32_0 : i32, i32
  }
  func.func @transform_4(%arg0: i32) -> (i32, i32) {
    %c0_i32 = arith.constant 0 : i32
    %c0_i32_0 = arith.constant 0 : i32
    %c0_i32_1 = arith.constant 0 : i32
    return %c0_i32, %c0_i32_0 : i32, i32
  }
  func.func @transform_5(%arg0: i32) -> (i32, i32) {
    %c0_i32 = arith.constant 0 : i32
    %c0_i32_0 = arith.constant 0 : i32
    return %c0_i32, %arg0 : i32, i32
  }
}

</mosaic_0001>

<bundles_post_ra>
// kernel: tpu_custom_call.1
= control target key start
LH: loop header
LB: loop body
LE: loop exit
PB: predicated region body
PF: predicated region fallthrough
CT: control target
= control target key end

     0   :  { %s250_s0 = inlined_call_operand.vmem [shape: f32[4,128], index: 0, kind: input, shape index: {}]   ;;  %s251_s1 = inlined_call_operand.vmem [shape: f32[16,4], index: 1, kind: input, shape index: {}]   ;;  %s252_s2 = inlined_call_operand.vmem [shape: f32[16,1], index: 2, kind: input, shape index: {}]   ;;  %s253_s3 = inlined_call_operand.vmem [shape: f32[16,1], index: 3, kind: input, shape index: {}]   ;;  %s254_s4 = inlined_call_operand.<no memory space> [shape: f32[1,1], index: 4, kind: input, shape index: {}]   ;;  %s255_s5 = inlined_call_operand.hbm [shape: f32[1,128], index: 5, kind: output, shape index: {}]  }
   0x1   :  { %v10_v0 = vstv %s254_s4 }
   0x2   :  { %11 = vst [vmem:[#allocation2] sm:$0x1] %v10_v0 }
   0x3   :  { %v24_v1 = vld [vmem:[%s251_s1] sm:$0xff]  ;;  %v188_v2 = vmov 1   ;;  %v189_v3 = vmov 0   ;;  %v25_v4 = vld [vmem:[%s251_s1 + $0x8] sm:$0xff] }
   0x4   :  { %159 = vset.pattern.permute.xlu1 %v188_v2  ;;  %158 = vset.pattern.permute.xlu0 %v189_v3 }
   0x5   :  { %43 = vperm.xlu1 %159, %v24_v1   ;;  %28 = vperm.xlu0 %158, %v24_v1  }
   0x6   :  { %12 = vsyncpa [#allocation4], 0  ;;  %v190_v5 = vmov 2   ;;  %v191_v6 = vmov 3   ;;  %v90_v7 = vld [vmem:[%s252_s2] sm:$0xff]  ;;  %v91_v9 = vld [vmem:[%s252_s2 + $0x8] sm:$0xff]  ;;  %v36_v12 = vlaneseq }
   0x7   :  { %v106_v8 = vld [vmem:[%s253_s3] sm:$0xff]  ;;  %v107_v10 = vld [vmem:[%s253_s3 + $0x8] sm:$0xff] }
   0x8   :  { %v37_v13 = vshrl.u32 %v36_v12, 7  ;;  %v23_v18 = vld [vmem:[%s250_s0] sm:$0xf]  ;;  %s192_s0 = smov [#allocation3]  }
   0x9   :  { %47 = vperm.xlu1 %159, %v25_v4   ;;  %33 = vperm.xlu0 %158, %v25_v4   ;;  %v127_v11 = vld [vmem:[#allocation2] sm:$0x1]  ;;  %s145_s2 = sshll.u32 %s192_s0, 4  ;;  %s146_s2 = int_to_ptr.vmem [resolvable:$true] %s145_s2 }
   0xa   :  { %v52_v16 = vsub.s32 1, %v37_v13  ;;  %v38_v17 = vsub.s32 0, %v37_v13  ;;  %v68_v19 = vsub.s32 2, %v37_v13  ;;  %v84_v25 = vsub.s32 3, %v37_v13  ;;  %s166_s3 = scalar_lea.vmem %s146_s2, 16  ;;  %s170_s7 = scalar_lea.vmem %s146_s2, 32 }
   0xb   :  { %p167_p0 = scmp.ne.s32.totalorder %s146_s2, %s166_s3  ;;  %p171_p1 = scmp.lt.s32.totalorder %s146_s2, %s146_s2 }
   0xc   :  { %v53_v22 = vrot.slane %v23_v18, %v52_v16  ;;  %v39_v23 = vrot.slane %v23_v18, %v38_v17  ;;  %v69_v24 = vrot.slane %v23_v18, %v68_v19  ;;  %v85_v31 = vrot.slane %v23_v18, %v84_v25  ;;  %p172_p2 = scmp.lt.s32.totalorder %s170_s7, %s166_s3 }
   0xd   :  { %161 = vset.pattern.permute.xlu1 %v190_v5  ;;  %160 = vset.pattern.permute.xlu0 %v190_v5 }
   0xe   :  { %63 = vperm.xlu1 %161, %v25_v4   ;;  %59 = vperm.xlu0 %160, %v24_v1   ;;  %p173_p3 = por %p172_p2, %p171_p1 }
  0x10   :  { %p174_p4 = pnand %p173_p3, %p167_p0 }
  0x12   :  { %162 = vset.pattern.permute.xlu1 %v191_v6  ;;  %163 = vset.pattern.permute.xlu0 %v191_v6 }
  0x13   :  { %75 = vperm.xlu1 %162, %v24_v1   ;;  %79 = vperm.xlu0 %163, %v25_v4  }
  0x17   :  { %164 = vset.pattern.permute.xlu1 %v189_v3  ;;  %165 = vset.pattern.permute.xlu0 %v189_v3 }
  0x18   :  { %94 = vperm.xlu1 %164, %v90_v7   ;;  %110 = vperm.xlu0 %165, %v106_v8  }
  0x1c   :  { %99 = vperm.xlu1 %164, %v91_v9  }
  0x20   :  { %115 = vperm.xlu1 %164, %v107_v10  }
  0x24   :  { %130 = vperm.xlu1 %164, %v127_v11  }
  0x80   :  { %v44_v14 = vpop.permute.xlu1 %43  ;;  %v29_v15 = vpop.permute.xlu0 %28 }
  0x81   :  { %v54_v26 = vmul.f32 %v53_v22, %v44_v14  ;;  %v40_v27 = vmul.f32 %v39_v23, %v29_v15 }
  0x83   :  { %v56_v32 = vadd.f32 %v54_v26, %v40_v27 }
  0x84   :  { %v48_v20 = vpop.permute.xlu1 %47  ;;  %v34_v21 = vpop.permute.xlu0 %33 }
  0x85   :  { %v55_v33 = vmul.f32 %v53_v22, %v48_v20  ;;  %v41_v34 = vmul.f32 %v39_v23, %v34_v21 }
  0x87   :  { %v57_v41 = vadd.f32 %v55_v33, %v41_v34 }
  0x89   :  { %v64_v28 = vpop.permute.xlu1 %63  ;;  %v60_v29 = vpop.permute.xlu0 %59 }
  0x8a   :  { %v70_v30 = vmul.f32 %v69_v24, %v60_v29  ;;  %v71_v39 = vmul.f32 %v69_v24, %v64_v28 }
  0x8c   :  { %v72_v36 = vadd.f32 %v70_v30, %v56_v32  ;;  %v73_v44 = vadd.f32 %v71_v39, %v57_v41 }
  0x8e   :  { %v76_v35 = vpop.permute.xlu1 %75  ;;  %v80_v38 = vpop.permute.xlu0 %79 }
  0x8f   :  { %v86_v37 = vmul.f32 %v85_v31, %v76_v35  ;;  %v87_v42 = vmul.f32 %v85_v31, %v80_v38 }
  0x91   :  { %v88_v40 = vadd.f32 %v86_v37, %v72_v36  ;;  %v89_v46 = vadd.f32 %v87_v42, %v73_v44 }
  0x93   :  { %v95_v43 = vpop.permute.xlu1 %94  ;;  %v111_v50 = vpop.permute.xlu0 %110 }
  0x94   :  { %v102_v45 = vadd.f32 %v95_v43, %v88_v40 }
  0x96   :  { %v104_v48 = vmax.f32 %v102_v45, 0.0 }
  0x97   :  { %v100_v47 = vpop.permute.xlu1 %99 }
  0x98   :  { %v103_v49 = vadd.f32 %v100_v47, %v89_v46  ;;  %v118_v53 = vmul.f32 %v111_v50, %v104_v48 }
  0x9a   :  { %v105_v51 = vmax.f32 %v103_v49, 0.0 }
  0x9b   :  { %v116_v52 = vpop.permute.xlu1 %115 }
  0x9c   :  { %v119_v54 = vmul.f32 %v116_v52, %v105_v51 }
  0x9e   :  { %v120_v55 = vadd.f32 %v119_v54, %v118_v53 }
  0x9f   :  { %v131_v60 = vpop.permute.xlu1 %130 }
  0xa0   :  { %v121_v56 = vrot.slane %v120_v55, 4  ;;  %v136_v62 = vrot.slane %v131_v60, %v38_v17 }
  0xa2   :  { %v122_v57 = vadd.f32 %v121_v56, %v120_v55 }
  0xa4   :  { %v123_v58 = vrot.slane %v122_v57, 2 }
  0xa6   :  { %v124_v59 = vadd.f32 %v123_v58, %v122_v57 }
  0xa8   :  { %v125_v61 = vrot.slane %v124_v59, 1 }
  0xaa   :  { %v126_v63 = vadd.f32 %v125_v61, %v124_v59 }
  0xac   :  { %v137_v0 = vadd.f32 %v136_v62, %v126_v63 }
  0xae   :  { %138 = vst [vmem:[#allocation3] sm:$0x1] %v137_v0 }
  0xaf   :  { %177 = shalt.err (!%p174_p4)
}
  0xb0   :  { %148 = dma.vmem_to_hbm [thread:$0]  %s146_s2, 16, %s255_s5, [#allocation4]  }
  0xb1   :  { %186 = dma.done.wait [#allocation4], 16  }
  0xb2   :  { %187 = vsyncadd [#allocation4], 4294967280 }
  0xb3   :  { %152 = vsyncpa [#allocation4], 1 }

</bundles_post_ra>
